<compile_context>
chip_gen: v5e
topology: v5e:2x2
jax: 0.10.0
libtpu: 0.0.40
codegen_flags: <defaults>
</compile_context>

<pallas_src>
import functools

import jax
import jax.numpy as jnp
from jax import lax
from jax.experimental import pallas as pl
from jax.experimental.pallas import tpu as pltpu

_NORM_SQ_EPS = 1e-16  # per-vector squared-norm clamp (~ torch eps=1e-8 on norms)


def _triplet_loss_kernel(e_ref, neg_ref, nscale_ref, nmask_ref, plog_ref,
                         out_ref, m_sc, s_sc, *, apply_mask):
    j = pl.program_id(1)
    nj = pl.num_programs(1)

    @pl.when(j == 0)
    def _init():
        # Online logsumexp starts from the positive-pair logit (the label-0
        # column of the torch sim_matrix): m = plog, sumexp = exp(plog-m) = 1.
        m_sc[...] = plog_ref[...]
        s_sc[...] = jnp.ones_like(s_sc)

    # MXU contraction on the raw streamed neg tile: (tm, D) . (tn, D)^T.
    raw = lax.dot_general(
        e_ref[...], neg_ref[...],
        dimension_numbers=(((1,), (1,)), ((), ())),
        preferred_element_type=jnp.float32)                    # (tm, tn) f32

    # Per-column inverse norms applied on the small (tm, tn) tile (the emb
    # norm and 1/temperature are already folded into e_ref by the wrapper).
    logits = raw * nscale_ref[...]

    # Online logsumexp over the negative-column axis (all math in f32).
    m_prev = m_sc[...]
    m_new = jnp.maximum(m_prev, jnp.max(logits, axis=-1, keepdims=True))
    p = jnp.exp(logits - m_new)
    if apply_mask:
        p = p * nmask_ref[...]            # zero out padded negative columns
    s_sc[...] = (jnp.exp(m_prev - m_new) * s_sc[...]
                 + jnp.sum(p, axis=-1, keepdims=True))
    m_sc[...] = m_new

    @pl.when(j == nj - 1)
    def _finalize():
        lse = m_sc[...] + jnp.log(s_sc[...])
        out_ref[...] = (lse - plog_ref[...]).astype(out_ref.dtype)


def _round_up(x, m):
    return (x + m - 1) // m * m


def _vmem_capacity_bytes():
    try:
        return int(pltpu.get_tpu_info().vmem_capacity_bytes)
    except Exception:
        return 64 * 1024 * 1024   # conservative (v7x-sized) fallback


def _choose_tiles(B, D, mm_itemsize, vmem_cap):
    """Pick (tm, tn).  tn matches the 256-wide MXU; tm grows as large as fits
    ~45% of VMEM, since neg is re-streamed from HBM Bp/tm times."""
    if B <= 256:
        t = min(256, _round_up(B, 128))   # pad lane dims to a 128 multiple
        return t, t
    tn = 256
    budget = int(0.45 * vmem_cap)
    tm = 128
    for cand in (1024, 512, 256, 128):
        if cand > _round_up(B, 128):
            continue
        use = 2 * cand * D * mm_itemsize + 3 * tn * D * mm_itemsize
        if use <= budget:
            tm = cand
            break
    return tm, tn


def triplet_inbatch_neg_softmax_contrast_loss(emb, pos, neg, temperature=0.05,
                                              add_swap_loss=False,
                                              matmul_dtype=jnp.bfloat16):
    """emb, pos, neg: (B, D) arrays.  Returns the scalar float32 loss.

    matmul_dtype: dtype of the MXU operands.  bf16 (default) halves streamed
    HBM bytes and uses the fast MXU path (expect ~1e-2-level absolute error on
    the loss); pass jnp.float32 for tight-accuracy results.
    """
    if add_swap_loss:
        # TODO(synk): add the optional swap (pair) loss term.
        raise NotImplementedError("add_swap_loss=True is not implemented")

    B, D = emb.shape
    assert pos.shape == (B, D) and neg.shape == (B, D)
    inv_t = 1.0 / float(temperature)

    # --- cheap fused XLA prologue (each input read once) -------------------
    emb_f = emb.astype(jnp.float32)
    pos_f = pos.astype(jnp.float32)
    neg_f = neg.astype(jnp.float32)

    emb_nsq = jnp.sum(emb_f * emb_f, axis=-1, keepdims=True)            # (B,1)
    pos_nsq = jnp.sum(pos_f * pos_f, axis=-1, keepdims=True)            # (B,1)
    neg_nsq = jnp.sum(neg_f * neg_f, axis=-1)                           # (B,)

    # Fold 1/temperature and 1/||emb|| into the query rows once.
    e_scaled = (emb_f * (lax.rsqrt(jnp.maximum(emb_nsq, _NORM_SQ_EPS)) * inv_t)
                ).astype(matmul_dtype)                                   # (B,D)
    # Positive-pair logit, with torch's eps clamp on the norm product.
    plog = (jnp.sum(emb_f * pos_f, axis=-1, keepdims=True)
            / jnp.maximum(jnp.sqrt(emb_nsq) * jnp.sqrt(pos_nsq), 1e-8)
            ) * inv_t                                                    # (B,1)
    # Per-negative-column inverse norms (applied post-matmul in the kernel).
    neg_scale = lax.rsqrt(jnp.maximum(neg_nsq, _NORM_SQ_EPS))[None, :]   # (1,B)
    neg_mm = neg.astype(matmul_dtype)           # raw neg, cast only; (B, D)

    # --- tiling / padding ---------------------------------------------------
    mm_itemsize = jnp.dtype(matmul_dtype).itemsize
    vmem_cap = _vmem_capacity_bytes()
    tm, tn = _choose_tiles(B, D, mm_itemsize, vmem_cap)
    Bp = _round_up(B, max(tm, tn))

    if Bp != B:
        rp = Bp - B
        e_scaled = jnp.pad(e_scaled, ((0, rp), (0, 0)))
        plog = jnp.pad(plog, ((0, rp), (0, 0)))
        neg_mm = jnp.pad(neg_mm, ((0, rp), (0, 0)))
        neg_scale = jnp.pad(neg_scale, ((0, 0), (0, rp)))
    col_mask = (jnp.arange(Bp)[None, :] < B).astype(jnp.float32)         # (1,Bp)

    grid = (Bp // tm, Bp // tn)
    nj = grid[1]

    # Streamed-operand BlockSpec; go 3-deep only for genuinely streaming
    # small-tile configs where the per-step matmul no longer hides the DMA.
    neg_spec = pl.BlockSpec((tn, D), lambda i, j: (j, 0))
    if nj >= 4 and tn * D * mm_itemsize <= (1 << 20):
        try:
            neg_spec = pl.BlockSpec((tn, D), lambda i, j: (j, 0),
                                    pipeline_mode=pl.Buffered(3))
        except Exception:
            pass   # older BlockSpec signature: fall back to default buffering

    blk_bytes = (2 * tm * D * mm_itemsize      # emb row block (double-buffered)
                 + 3 * tn * D * mm_itemsize    # streamed neg blocks
                 + 4 * tn * 4 + 6 * tm * 4)    # scale/mask/plog/out/scratch
    vmem_limit = int(min(0.8 * vmem_cap, max(32 * 1024 * 1024, 2 * blk_bytes)))

    kernel = functools.partial(_triplet_loss_kernel, apply_mask=(Bp != B))

    out = pl.pallas_call(
        kernel,
        out_shape=jax.ShapeDtypeStruct((Bp, 1), jnp.float32),
        grid_spec=pltpu.PrefetchScalarGridSpec(
            num_scalar_prefetch=0,
            grid=grid,
            in_specs=[
                pl.BlockSpec((tm, D), lambda i, j: (i, 0)),  # emb rows (resident over j)
                neg_spec,                                    # neg tiles (streamed)
                pl.BlockSpec((1, tn), lambda i, j: (0, j)),  # per-column inv norms
                pl.BlockSpec((1, tn), lambda i, j: (0, j)),  # pad-column 0/1 mask
                pl.BlockSpec((tm, 1), lambda i, j: (i, 0)),  # positive-pair logit
            ],
            out_specs=pl.BlockSpec((tm, 1), lambda i, j: (i, 0)),
            scratch_shapes=[
                pltpu.VMEM((tm, 1), jnp.float32),   # running max
                pltpu.VMEM((tm, 1), jnp.float32),   # running sum-exp
            ]),
        compiler_params=pltpu.CompilerParams(
            dimension_semantics=("parallel", "arbitrary"),
            vmem_limit_bytes=vmem_limit),
    )(e_scaled, neg_mm, neg_scale, col_mask, plog)

    # Tiny final reduction (padded rows sliced away) in the wrapper.
    return jnp.mean(out[:B, 0])


def _reference_loss(emb, pos, neg, temperature=0.05):
    """Pure-JAX reference mirroring the PyTorch forward."""
    eps = 1e-8

    def cos(a, b):
        num = jnp.sum(a * b, axis=-1)
        den = jnp.maximum(
            jnp.linalg.norm(a, axis=-1) * jnp.linalg.norm(b, axis=-1), eps)
        return num / den

    sim_pos = cos(emb, pos)                                   # (B,)
    sim_neg = cos(emb[:, None, :], neg[None, :, :])           # (B, B)
    sim_matrix = jnp.concatenate([sim_pos[:, None], sim_neg], axis=1) / temperature
    lse = jax.scipy.special.logsumexp(sim_matrix, axis=-1)
    return jnp.mean(lse - sim_matrix[:, 0])


if __name__ == "__main__":
    key = jax.random.PRNGKey(0)

    def run_case(B, D, seed):
        k1, k2, k3 = jax.random.split(jax.random.fold_in(key, seed), 3)
        emb = jax.random.normal(k1, (B, D), dtype=jnp.float32)
        pos = jax.random.normal(k2, (B, D), dtype=jnp.float32)
        neg = jax.random.normal(k3, (B, D), dtype=jnp.float32)
        ref = _reference_loss(emb, pos, neg, temperature=0.05)

        # Exact-path check (f32 MXU operands): tight tolerance.
        loss_f32 = jax.block_until_ready(
            triplet_inbatch_neg_softmax_contrast_loss(
                emb, pos, neg, temperature=0.05, matmul_dtype=jnp.float32))
        assert jnp.allclose(loss_f32, ref, atol=1e-4, rtol=1e-4), (B, D, loss_f32, ref)

        # Default fast path (bf16 MXU operands, f32 accumulation): bf16
        # operand rounding gives ~1e-2-level absolute error on the loss.
        loss_bf16 = jax.block_until_ready(
            triplet_inbatch_neg_softmax_contrast_loss(emb, pos, neg, temperature=0.05))
        assert jnp.allclose(loss_bf16, ref, atol=1e-1, rtol=5e-2), (B, D, loss_bf16, ref)

    run_case(8, 32, 1)      # single tile, rows/cols padded 8 -> 128 (mask path)
    run_case(12, 32, 2)     # padding + column masking
    run_case(300, 256, 3)   # multi-tile 2x2 grid, padding 300 -> 512

    print("KERNEL_OK")
</pallas_src>

<mosaic_0001>
module attributes {stable_mosaic.version = 11 : i64} {
  func.func @_triplet_loss_kernel(%arg0: i32, %arg1: i32, %arg2: memref<128x32xf32, #tpu.memory_space<vmem>>, %arg3: memref<128x32xf32, #tpu.memory_space<vmem>>, %arg4: memref<1x128xf32, #tpu.memory_space<vmem>>, %arg5: memref<1x128xf32, #tpu.memory_space<vmem>>, %arg6: memref<128x1xf32, #tpu.memory_space<vmem>>, %arg7: memref<128x1xf32, #tpu.memory_space<vmem>>, %arg8: memref<128x1xf32, #tpu.memory_space<vmem>>, %arg9: memref<128x1xf32, #tpu.memory_space<vmem>>) attributes {dimension_semantics = [#tpu.dimension_semantics<parallel>, #tpu.dimension_semantics<arbitrary>], iteration_bounds = array<i64: 1, 1>, scalar_prefetch = 0 : i64, scratch_operands = 2 : i64, tpu.core_type = #tpu.core_type<tc>, window_params = [{transform_indices = @transform_0, window_bounds = array<i64: 128, 32>}, {transform_indices = @transform_1, window_bounds = array<i64: 128, 32>}, {transform_indices = @transform_2, window_bounds = array<i64: 1, 128>}, {transform_indices = @transform_3, window_bounds = array<i64: 1, 128>}, {transform_indices = @transform_4, window_bounds = array<i64: 128, 1>}, {transform_indices = @transform_5, window_bounds = array<i64: 128, 1>}]} {
    %c0_i32 = arith.constant 0 : i32
    %0 = arith.cmpi eq, %arg1, %c0_i32 : i32
    %1 = arith.extui %0 : i1 to i32
    %c0_i32_0 = arith.constant 0 : i32
    %2 = arith.cmpi ne, %1, %c0_i32_0 : i32
    scf.if %2 {
      %c0_20 = arith.constant 0 : index
      %c0_21 = arith.constant 0 : index
      %31 = vector.load %arg6[%c0_20, %c0_21] : memref<128x1xf32, #tpu.memory_space<vmem>>, vector<128x1xf32>
      %c0_22 = arith.constant 0 : index
      %c0_23 = arith.constant 0 : index
      %32 = vector.load %arg8[%c0_22, %c0_23] : memref<128x1xf32, #tpu.memory_space<vmem>>, vector<128x1xf32>
      tpu.vector_store %arg8[%c0_22, %c0_23], %31 {strides = array<i32>} : memref<128x1xf32, #tpu.memory_space<vmem>>, vector<128x1xf32>,
      %cst_24 = arith.constant 1.000000e+00 : f32
      %33 = vector.broadcast %cst_24 : f32 to vector<128x1xf32>
      %c0_25 = arith.constant 0 : index
      %c0_26 = arith.constant 0 : index
      %34 = vector.load %arg9[%c0_25, %c0_26] : memref<128x1xf32, #tpu.memory_space<vmem>>, vector<128x1xf32>
      tpu.vector_store %arg9[%c0_25, %c0_26], %33 {strides = array<i32>} : memref<128x1xf32, #tpu.memory_space<vmem>>, vector<128x1xf32>,
    } else {
    }
    %c0 = arith.constant 0 : index
    %c0_1 = arith.constant 0 : index
    %3 = vector.load %arg2[%c0, %c0_1] : memref<128x32xf32, #tpu.memory_space<vmem>>, vector<128x32xf32>
    %c0_2 = arith.constant 0 : index
    %c0_3 = arith.constant 0 : index
    %4 = vector.load %arg3[%c0_2, %c0_3] : memref<128x32xf32, #tpu.memory_space<vmem>>, vector<128x32xf32>
    %cst = arith.constant dense<0.000000e+00> : vector<128x128xf32>
    %5 = tpu.matmul %3, %4, %cst {dimension_numbers = #tpu.dot_dimension_numbers<[1], [1], [0], [0], [0, 0, 1, 0], [], []>} : vector<128x32xf32>, vector<128x32xf32>, vector<128x128xf32> -> vector<128x128xf32>
    %c0_4 = arith.constant 0 : index
    %c0_5 = arith.constant 0 : index
    %6 = vector.load %arg4[%c0_4, %c0_5] : memref<1x128xf32, #tpu.memory_space<vmem>>, vector<1x128xf32>
    %7 = vector.broadcast %6 : vector<1x128xf32> to vector<128x128xf32>
    %8 = arith.mulf %5, %7 : vector<128x128xf32>
    %c0_6 = arith.constant 0 : index
    %c0_7 = arith.constant 0 : index
    %9 = vector.load %arg8[%c0_6, %c0_7] : memref<128x1xf32, #tpu.memory_space<vmem>>, vector<128x1xf32>
    %cst_8 = arith.constant dense<0xFF800000> : vector<128xf32>
    %10 = vector.multi_reduction <maximumf>, %8, %cst_8 [1] : vector<128x128xf32> to vector<128xf32>
    %11 = vector.shape_cast %10 : vector<128xf32> to vector<128x1xf32>
    %12 = arith.maximumf %9, %11 : vector<128x1xf32>
    %13 = vector.broadcast %12 : vector<128x1xf32> to vector<128x128xf32>
    %14 = arith.subf %8, %13 : vector<128x128xf32>
    %15 = math.exp %14 : vector<128x128xf32>
    %c0_9 = arith.constant 0 : index
    %c0_10 = arith.constant 0 : index
    %16 = vector.load %arg5[%c0_9, %c0_10] : memref<1x128xf32, #tpu.memory_space<vmem>>, vector<1x128xf32>
    %17 = vector.broadcast %16 : vector<1x128xf32> to vector<128x128xf32>
    %18 = arith.mulf %15, %17 : vector<128x128xf32>
    %19 = arith.subf %9, %12 : vector<128x1xf32>
    %20 = math.exp %19 : vector<128x1xf32>
    %c0_11 = arith.constant 0 : index
    %c0_12 = arith.constant 0 : index
    %21 = vector.load %arg9[%c0_11, %c0_12] : memref<128x1xf32, #tpu.memory_space<vmem>>, vector<128x1xf32>
    %22 = arith.mulf %20, %21 : vector<128x1xf32>
    %cst_13 = arith.constant dense<0.000000e+00> : vector<128xf32>
    %23 = vector.multi_reduction <add>, %18, %cst_13 [1] : vector<128x128xf32> to vector<128xf32>
    %24 = vector.shape_cast %23 : vector<128xf32> to vector<128x1xf32>
    %25 = arith.addf %22, %24 : vector<128x1xf32>
    %c0_14 = arith.constant 0 : index
    %c0_15 = arith.constant 0 : index
    %26 = vector.load %arg9[%c0_14, %c0_15] : memref<128x1xf32, #tpu.memory_space<vmem>>, vector<128x1xf32>
    tpu.vector_store %arg9[%c0_14, %c0_15], %25 {strides = array<i32>} : memref<128x1xf32, #tpu.memory_space<vmem>>, vector<128x1xf32>,
    %c0_16 = arith.constant 0 : index
    %c0_17 = arith.constant 0 : index
    %27 = vector.load %arg8[%c0_16, %c0_17] : memref<128x1xf32, #tpu.memory_space<vmem>>, vector<128x1xf32>
    tpu.vector_store %arg8[%c0_16, %c0_17], %12 {strides = array<i32>} : memref<128x1xf32, #tpu.memory_space<vmem>>, vector<128x1xf32>,
    %c0_i32_18 = arith.constant 0 : i32
    %28 = arith.cmpi eq, %arg1, %c0_i32_18 : i32
    %29 = arith.extui %28 : i1 to i32
    %c0_i32_19 = arith.constant 0 : i32
    %30 = arith.cmpi ne, %29, %c0_i32_19 : i32
    scf.if %30 {
      %c0_20 = arith.constant 0 : index
      %c0_21 = arith.constant 0 : index
      %31 = vector.load %arg8[%c0_20, %c0_21] : memref<128x1xf32, #tpu.memory_space<vmem>>, vector<128x1xf32>
      %c0_22 = arith.constant 0 : index
      %c0_23 = arith.constant 0 : index
      %32 = vector.load %arg9[%c0_22, %c0_23] : memref<128x1xf32, #tpu.memory_space<vmem>>, vector<128x1xf32>
      %33 = math.log %32 : vector<128x1xf32>
      %34 = arith.addf %31, %33 : vector<128x1xf32>
      %c0_24 = arith.constant 0 : index
      %c0_25 = arith.constant 0 : index
      %35 = vector.load %arg6[%c0_24, %c0_25] : memref<128x1xf32, #tpu.memory_space<vmem>>, vector<128x1xf32>
      %36 = arith.subf %34, %35 : vector<128x1xf32>
      %c0_26 = arith.constant 0 : index
      %c0_27 = arith.constant 0 : index
      %37 = vector.load %arg7[%c0_26, %c0_27] : memref<128x1xf32, #tpu.memory_space<vmem>>, vector<128x1xf32>
      tpu.vector_store %arg7[%c0_26, %c0_27], %36 {strides = array<i32>} : memref<128x1xf32, #tpu.memory_space<vmem>>, vector<128x1xf32>,
    } else {
    }
    return
  }
  func.func @transform_0(%arg0: i32, %arg1: i32) -> (i32, i32) {
    %c0_i32 = arith.constant 0 : i32
    %c0_i32_0 = arith.constant 0 : i32
    return %arg0, %c0_i32 : i32, i32
  }
  func.func @transform_1(%arg0: i32, %arg1: i32) -> (i32, i32) {
    %c0_i32 = arith.constant 0 : i32
    %c0_i32_0 = arith.constant 0 : i32
    return %arg1, %c0_i32 : i32, i32
  }
  func.func @transform_2(%arg0: i32, %arg1: i32) -> (i32, i32) {
    %c0_i32 = arith.constant 0 : i32
    %c0_i32_0 = arith.constant 0 : i32
    return %c0_i32, %arg1 : i32, i32
  }
  func.func @transform_3(%arg0: i32, %arg1: i32) -> (i32, i32) {
    %c0_i32 = arith.constant 0 : i32
    %c0_i32_0 = arith.constant 0 : i32
    return %c0_i32, %arg1 : i32, i32
  }
  func.func @transform_4(%arg0: i32, %arg1: i32) -> (i32, i32) {
    %c0_i32 = arith.constant 0 : i32
    %c0_i32_0 = arith.constant 0 : i32
    return %arg0, %c0_i32 : i32, i32
  }
  func.func @transform_5(%arg0: i32, %arg1: i32) -> (i32, i32) {
    %c0_i32 = arith.constant 0 : i32
    %c0_i32_0 = arith.constant 0 : i32
    return %arg0, %c0_i32 : i32, i32
  }
}

</mosaic_0001>

<bundles_post_ra>
// kernel: tpu_custom_call.1
= control target key start
LH: loop header
LB: loop body
LE: loop exit
PB: predicated region body
PF: predicated region fallthrough
CT: control target
= control target key end

     0   :  { %vm105_vm0 = vcmask 261120   ;;  %vm40_vm1 = vcmask 7168   ;;  %s1709_s1 = inlined_call_operand.vmem [shape: f32[128,32], index: 1, kind: input, shape index: {}]   ;;  %s1710_s2 = inlined_call_operand.vmem [shape: f32[1,128], index: 2, kind: input, shape index: {}]   ;;  %s1711_s0 = inlined_call_operand.vmem [shape: f32[128,32], index: 0, kind: input, shape index: {}]   ;;  %s1712_s4 = inlined_call_operand.vmem [shape: f32[128,1], index: 4, kind: input, shape index: {}]   ;;  %s1713_s3 = inlined_call_operand.vmem [shape: f32[1,128], index: 3, kind: input, shape index: {}]   ;;  %s1714_s5 = inlined_call_operand.vmem [shape: f32[128,1], index: 5, kind: output, shape index: {}]  }
   0x1   :  { %v104_v0 = vld [vmem:[%s1709_s1 + $0x78] sm:$0xff]  ;;  %v103_v1 = vld [vmem:[%s1709_s1 + $0x70] sm:$0xff]  ;;  %v102_v2 = vld [vmem:[%s1709_s1 + $0x68] sm:$0xff] }
   0x2   :  { %795 = vmatpush.xpose.msk.msra.mxu0 %vm105_vm0, %v104_v0  ;;  %829 = vmatpush.xpose.msk.msra.mxu3 %vm105_vm0, %v104_v0  ;;  %v101_v3 = vld [vmem:[%s1709_s1 + $0x60] sm:$0xff]  ;;  %v100_v4 = vld [vmem:[%s1709_s1 + $0x58] sm:$0xff]  ;;  %v99_v5 = vld [vmem:[%s1709_s1 + $0x50] sm:$0xff] }
   0x3   :  { %827 = vmatpush.xpose.msk.msra.mxu1 %vm105_vm0, %v104_v0  ;;  %828 = vmatpush.xpose.msk.msra.mxu2 %vm105_vm0, %v104_v0  ;;  %v98_v6 = vld [vmem:[%s1709_s1 + $0x48] sm:$0xff]  ;;  %v97_v7 = vld [vmem:[%s1709_s1 + $0x40] sm:$0xff]  ;;  %v96_v8 = vld [vmem:[%s1709_s1 + $0x38] sm:$0xff] }
   0x4   :  { %v95_v9 = vld [vmem:[%s1709_s1 + $0x30] sm:$0xff]  ;;  %v94_v10 = vld [vmem:[%s1709_s1 + $0x28] sm:$0xff]  ;;  %v93_v11 = vld [vmem:[%s1709_s1 + $0x20] sm:$0xff] }
   0x5   :  { %v92_v12 = vld [vmem:[%s1709_s1 + $0x18] sm:$0xff]  ;;  %v91_v13 = vld [vmem:[%s1709_s1 + $0x10] sm:$0xff]  ;;  %v90_v14 = vld [vmem:[%s1709_s1 + $0x8] sm:$0xff] }
   0x6   :  { %796 = vmatpush.xpose.msk.msra.mxu0 %vm105_vm0, %v103_v1  ;;  %832 = vmatpush.xpose.msk.msra.mxu3 %vm105_vm0, %v103_v1  ;;  %v89_v15 = vld [vmem:[%s1709_s1] sm:$0xff]  ;;  %v74_v20 = vld [vmem:[%s1711_s0 + $0x8] sm:$0xff]  ;;  %v87_v24 = vld [vmem:[%s1711_s0 + $0x70] sm:$0xff] }
   0x7   :  { %830 = vmatpush.xpose.msk.msra.mxu1 %vm105_vm0, %v103_v1  ;;  %831 = vmatpush.xpose.msk.msra.mxu2 %vm105_vm0, %v103_v1  ;;  %v73_v16 = vld [vmem:[%s1711_s0] sm:$0xff]  ;;  %v86_v21 = vld [vmem:[%s1711_s0 + $0x68] sm:$0xff]  ;;  %v75_v25 = vld [vmem:[%s1711_s0 + $0x10] sm:$0xff] }
   0x8   :  { %v85_v17 = vld [vmem:[%s1711_s0 + $0x60] sm:$0xff]  ;;  %v82_v22 = vld [vmem:[%s1711_s0 + $0x48] sm:$0xff]  ;;  %v79_v26 = vld [vmem:[%s1711_s0 + $0x30] sm:$0xff] }
   0x9   :  { %v77_v18 = vld [vmem:[%s1711_s0 + $0x20] sm:$0xff]  ;;  %v78_v23 = vld [vmem:[%s1711_s0 + $0x28] sm:$0xff]  ;;  %v83_v27 = vld [vmem:[%s1711_s0 + $0x50] sm:$0xff] }
   0xa   :  { %797 = vmatpush.xpose.msk.msra.mxu0 %vm105_vm0, %v102_v2  ;;  %835 = vmatpush.xpose.msk.msra.mxu3 %vm105_vm0, %v102_v2  ;;  %v81_v19 = vld [vmem:[%s1711_s0 + $0x40] sm:$0xff]  ;;  %v88_v28 = vld [vmem:[%s1711_s0 + $0x78] sm:$0xff] }
   0xb   :  { %833 = vmatpush.xpose.msk.msra.mxu1 %vm105_vm0, %v102_v2  ;;  %834 = vmatpush.xpose.msk.msra.mxu2 %vm105_vm0, %v102_v2  ;;  %v76_v29 = vld [vmem:[%s1711_s0 + $0x18] sm:$0xff]  ;;  %v880_v32 = vld [vmem:[%s1710_s2] ss:$0 sm:$0xff] }
   0xc   :  { %v84_v30 = vld [vmem:[%s1711_s0 + $0x58] sm:$0xff]  ;;  %v1211_v48 = vld [vmem:[%s1712_s4] sm:$0xff] }
   0xd   :  { %v80_v31 = vld [vmem:[%s1711_s0 + $0x38] sm:$0xff]  ;;  %41 = vst.msk [vmem:[#allocation2] sm:$0xff] %vm40_vm1, %v1211_v48  ;;  %v1247_v2 = vld [vmem:[%s1712_s4 + $0x20] sm:$0xff] }
   0xe   :  { %798 = vmatpush.xpose.msk.msra.mxu0 %vm105_vm0, %v101_v3  ;;  %838 = vmatpush.xpose.msk.msra.mxu3 %vm105_vm0, %v101_v3  ;;  %45 = vst.msk [vmem:[#allocation2 + $0x20] sm:$0xff] %vm40_vm1, %v1247_v2 }
   0xf   :  { %836 = vmatpush.xpose.msk.msra.mxu1 %vm105_vm0, %v101_v3  ;;  %837 = vmatpush.xpose.msk.msra.mxu2 %vm105_vm0, %v101_v3  ;;  %v1252_v3 = vld [vmem:[%s1712_s4 + $0x60] sm:$0xff] }
  0x10   :  { %53 = vst.msk [vmem:[#allocation2 + $0x60] sm:$0xff] %vm40_vm1, %v1252_v3 }
  0x12   :  { %799 = vmatpush.xpose.msk.msra.mxu0 %vm105_vm0, %v100_v4  ;;  %841 = vmatpush.xpose.msk.msra.mxu3 %vm105_vm0, %v100_v4 }
  0x13   :  { %839 = vmatpush.xpose.msk.msra.mxu1 %vm105_vm0, %v100_v4  ;;  %840 = vmatpush.xpose.msk.msra.mxu2 %vm105_vm0, %v100_v4  ;;  %v978_v4 = vmov 0  }
  0x14   :  { %877 = vset.pattern.permute.xlu1 %v978_v4  ;;  %878 = vset.pattern.permute.xlu0 %v978_v4 }
  0x15   :  { %879 = vset.pattern.permute.xlu2 %v978_v4 }
  0x16   :  { %800 = vmatpush.xpose.msk.msra.mxu0 %vm105_vm0, %v99_v5  ;;  %844 = vmatpush.xpose.msk.msra.mxu3 %vm105_vm0, %v99_v5 }
  0x17   :  { %842 = vmatpush.xpose.msk.msra.mxu1 %vm105_vm0, %v99_v5  ;;  %843 = vmatpush.xpose.msk.msra.mxu2 %vm105_vm0, %v99_v5  ;;  %v1261_v5 = vld [vmem:[%s1712_s4 + $0x40] sm:$0xff] }
  0x18   :  { %1731 = vst [vmem:[#allocation4_spill] sm:$0xff] %v1261_v5 }
  0x19   :  { %49 = vst.msk [vmem:[#allocation2 + $0x40] sm:$0xff] %vm40_vm1, %v1261_v5 }
  0x1a   :  { %801 = vmatpush.xpose.msk.msra.mxu0 %vm105_vm0, %v98_v6  ;;  %847 = vmatpush.xpose.msk.msra.mxu3 %vm105_vm0, %v98_v6 }
  0x1b   :  { %845 = vmatpush.xpose.msk.msra.mxu1 %vm105_vm0, %v98_v6  ;;  %846 = vmatpush.xpose.msk.msra.mxu2 %vm105_vm0, %v98_v6  ;;  %v1266_v6 = vld [vmem:[%s1712_s4 + $0x8] sm:$0xff] }
  0x1c   :  { %1732 = vst [vmem:[#allocation5_spill] sm:$0xff] %v1266_v6 }
  0x1d   :  { %42 = vst.msk [vmem:[#allocation2 + $0x8] sm:$0xff] %vm40_vm1, %v1266_v6 }
  0x1e   :  { %802 = vmatpush.xpose.msk.msra.mxu0 %vm105_vm0, %v97_v7  ;;  %850 = vmatpush.xpose.msk.msra.mxu3 %vm105_vm0, %v97_v7 }
  0x1f   :  { %848 = vmatpush.xpose.msk.msra.mxu1 %vm105_vm0, %v97_v7  ;;  %849 = vmatpush.xpose.msk.msra.mxu2 %vm105_vm0, %v97_v7  ;;  %v979_v7 = vmov 1.0  }
  0x20   :  { %57 = vst.msk [vmem:[#allocation3] sm:$0xff] %vm40_vm1, %v979_v7 }
  0x21   :  { %58 = vst.msk [vmem:[#allocation3 + $0x8] sm:$0xff] %vm40_vm1, %v979_v7 }
  0x22   :  { %803 = vmatpush.xpose.msk.msra.mxu0 %vm105_vm0, %v96_v8  ;;  %853 = vmatpush.xpose.msk.msra.mxu3 %vm105_vm0, %v96_v8  ;;  %59 = vst.msk [vmem:[#allocation3 + $0x10] sm:$0xff] %vm40_vm1, %v979_v7 }
  0x23   :  { %851 = vmatpush.xpose.msk.msra.mxu1 %vm105_vm0, %v96_v8  ;;  %852 = vmatpush.xpose.msk.msra.mxu2 %vm105_vm0, %v96_v8  ;;  %60 = vst.msk [vmem:[#allocation3 + $0x18] sm:$0xff] %vm40_vm1, %v979_v7  ;;  %v1281_v8 = vld [vmem:[%s1712_s4 + $0x28] sm:$0xff] }
  0x24   :  { %61 = vst.msk [vmem:[#allocation3 + $0x20] sm:$0xff] %vm40_vm1, %v979_v7 }
  0x25   :  { %62 = vst.msk [vmem:[#allocation3 + $0x28] sm:$0xff] %vm40_vm1, %v979_v7 }
  0x26   :  { %804 = vmatpush.xpose.msk.msra.mxu0 %vm105_vm0, %v95_v9  ;;  %856 = vmatpush.xpose.msk.msra.mxu3 %vm105_vm0, %v95_v9  ;;  %1733 = vst [vmem:[#allocation6_spill] sm:$0xff] %v1281_v8 }
  0x27   :  { %854 = vmatpush.xpose.msk.msra.mxu1 %vm105_vm0, %v95_v9  ;;  %855 = vmatpush.xpose.msk.msra.mxu2 %vm105_vm0, %v95_v9  ;;  %v1286_v9 = vld [vmem:[%s1712_s4 + $0x48] sm:$0xff]  ;;  %63 = vst.msk [vmem:[#allocation3 + $0x30] sm:$0xff] %vm40_vm1, %v979_v7 }
  0x28   :  { %1734 = vst [vmem:[#allocation7_spill] sm:$0xff] %v1286_v9 }
  0x29   :  { %46 = vst.msk [vmem:[#allocation2 + $0x28] sm:$0xff] %vm40_vm1, %v1281_v8 }
  0x2a   :  { %805 = vmatpush.xpose.msk.msra.mxu0 %vm105_vm0, %v94_v10  ;;  %859 = vmatpush.xpose.msk.msra.mxu3 %vm105_vm0, %v94_v10  ;;  %50 = vst.msk [vmem:[#allocation2 + $0x48] sm:$0xff] %vm40_vm1, %v1286_v9 }
  0x2b   :  { %857 = vmatpush.xpose.msk.msra.mxu1 %vm105_vm0, %v94_v10  ;;  %858 = vmatpush.xpose.msk.msra.mxu2 %vm105_vm0, %v94_v10  ;;  %64 = vst.msk [vmem:[#allocation3 + $0x38] sm:$0xff] %vm40_vm1, %v979_v7  ;;  %v1301_v10 = vld [vmem:[%s1712_s4 + $0x68] sm:$0xff] }
  0x2c   :  { %65 = vst.msk [vmem:[#allocation3 + $0x40] sm:$0xff] %vm40_vm1, %v979_v7 }
  0x2d   :  { %66 = vst.msk [vmem:[#allocation3 + $0x48] sm:$0xff] %vm40_vm1, %v979_v7 }
  0x2e   :  { %806 = vmatpush.xpose.msk.msra.mxu0 %vm105_vm0, %v93_v11  ;;  %862 = vmatpush.xpose.msk.msra.mxu3 %vm105_vm0, %v93_v11  ;;  %67 = vst.msk [vmem:[#allocation3 + $0x50] sm:$0xff] %vm40_vm1, %v979_v7 }
  0x2f   :  { %860 = vmatpush.xpose.msk.msra.mxu1 %vm105_vm0, %v93_v11  ;;  %861 = vmatpush.xpose.msk.msra.mxu2 %vm105_vm0, %v93_v11  ;;  %68 = vst.msk [vmem:[#allocation3 + $0x58] sm:$0xff] %vm40_vm1, %v979_v7  ;;  %v1306_v11 = vld [vmem:[%s1712_s4 + $0x30] sm:$0xff] }
  0x30   :  { %1735 = vst [vmem:[#allocation8_spill] sm:$0xff] %v1301_v10 }
  0x31   :  { %1736 = vst [vmem:[#allocation9_spill] sm:$0xff] %v1306_v11 }
  0x32   :  { %807 = vmatpush.xpose.msk.msra.mxu0 %vm105_vm0, %v92_v12  ;;  %865 = vmatpush.xpose.msk.msra.mxu3 %vm105_vm0, %v92_v12  ;;  %69 = vst.msk [vmem:[#allocation3 + $0x60] sm:$0xff] %vm40_vm1, %v979_v7 }
  0x33   :  { %863 = vmatpush.xpose.msk.msra.mxu1 %vm105_vm0, %v92_v12  ;;  %864 = vmatpush.xpose.msk.msra.mxu2 %vm105_vm0, %v92_v12  ;;  %54 = vst.msk [vmem:[#allocation2 + $0x68] sm:$0xff] %vm40_vm1, %v1301_v10  ;;  %v1314_v12 = vld [vmem:[%s1712_s4 + $0x10] sm:$0xff] }
  0x34   :  { %1737 = vst [vmem:[#allocation10_spill] sm:$0xff] %v1314_v12 }
  0x35   :  { %47 = vst.msk [vmem:[#allocation2 + $0x30] sm:$0xff] %vm40_vm1, %v1306_v11 }
  0x36   :  { %808 = vmatpush.xpose.msk.msra.mxu0 %vm105_vm0, %v91_v13  ;;  %868 = vmatpush.xpose.msk.msra.mxu3 %vm105_vm0, %v91_v13  ;;  %43 = vst.msk [vmem:[#allocation2 + $0x10] sm:$0xff] %vm40_vm1, %v1314_v12 }
  0x37   :  { %866 = vmatpush.xpose.msk.msra.mxu1 %vm105_vm0, %v91_v13  ;;  %867 = vmatpush.xpose.msk.msra.mxu2 %vm105_vm0, %v91_v13  ;;  %70 = vst.msk [vmem:[#allocation3 + $0x68] sm:$0xff] %vm40_vm1, %v979_v7  ;;  %v1322_v13 = vld [vmem:[#allocation2] sm:$0xff] }
  0x38   :  { %71 = vst.msk [vmem:[#allocation3 + $0x70] sm:$0xff] %vm40_vm1, %v979_v7 }
  0x39   :  { %72 = vst.msk [vmem:[#allocation3 + $0x78] sm:$0xff] %vm40_vm1, %v979_v7 }
  0x3a   :  { %809 = vmatpush.xpose.msk.msra.mxu0 %vm105_vm0, %v90_v14  ;;  %871 = vmatpush.xpose.msk.msra.mxu3 %vm105_vm0, %v90_v14 }
  0x3b   :  { %869 = vmatpush.xpose.msk.msra.mxu1 %vm105_vm0, %v90_v14  ;;  %870 = vmatpush.xpose.msk.msra.mxu2 %vm105_vm0, %v90_v14  ;;  %v1325_v14 = vld [vmem:[#allocation2 + $0x20] sm:$0xff] }
  0x3e   :  { %810 = vmatpush.xpose.msk.msra.mxu0 %vm105_vm0, %v89_v15  ;;  %874 = vmatpush.xpose.msk.msra.mxu3 %vm105_vm0, %v89_v15 }
  0x3f   :  { %872 = vmatpush.xpose.msk.msra.mxu1 %vm105_vm0, %v89_v15  ;;  %873 = vmatpush.xpose.msk.msra.mxu2 %vm105_vm0, %v89_v15 }
  0x41   :  { %811 = vmatmul.msk.f32.vlgmr.msra.gmra.mxu0 %vm105_vm0, %v73_v16  ;;  %823 = vmatmul.msk.f32.vlgmr.msra.gmra.mxu3 %vm105_vm0, %v85_v17 }
  0x42   :  { %815 = vmatmul.msk.f32.vlgmr.msra.gmra.mxu1 %vm105_vm0, %v77_v18  ;;  %819 = vmatmul.msk.f32.vlgmr.msra.gmra.mxu2 %vm105_vm0, %v81_v19  ;;  %v1333_v18 = vld [vmem:[%s1712_s4 + $0x70] sm:$0xff] }
  0x43   :  { %1738 = vst [vmem:[#allocation11_spill] sm:$0xff] %v1333_v18 }
  0x44   :  { %55 = vst.msk [vmem:[#allocation2 + $0x70] sm:$0xff] %vm40_vm1, %v1333_v18 }
  0x49   :  { %812 = vmatmul.msk.f32.gmra.mxu0 %vm105_vm0, %v74_v20  ;;  %824 = vmatmul.msk.f32.gmra.mxu3 %vm105_vm0, %v86_v21  ;;  %v1343_v20 = vld [vmem:[%s1712_s4 + $0x78] sm:$0xff] }
  0x4a   :  { %820 = vmatmul.msk.f32.gmra.mxu2 %vm105_vm0, %v82_v22  ;;  %816 = vmatmul.msk.f32.gmra.mxu1 %vm105_vm0, %v78_v23  ;;  %1739 = vst [vmem:[#allocation12_spill] sm:$0xff] %v1343_v20  ;;  %v1353_v22 = vld [vmem:[%s1712_s4 + $0x50] sm:$0xff] }
  0x4b   :  { %1740 = vst [vmem:[#allocation13_spill] sm:$0xff] %v1353_v22 }
  0x4c   :  { %56 = vst.msk [vmem:[#allocation2 + $0x78] sm:$0xff] %vm40_vm1, %v1343_v20 }
  0x4d   :  { %51 = vst.msk [vmem:[#allocation2 + $0x50] sm:$0xff] %vm40_vm1, %v1353_v22 }
  0x51   :  { %825 = vmatmul.msk.f32.gmra.mxu3 %vm105_vm0, %v87_v24  ;;  %813 = vmatmul.msk.f32.gmra.mxu0 %vm105_vm0, %v75_v25  ;;  %v1361_v24 = vld [vmem:[#allocation2 + $0x60] sm:$0xff] }
  0x52   :  { %817 = vmatmul.msk.f32.gmra.mxu1 %vm105_vm0, %v79_v26  ;;  %821 = vmatmul.msk.f32.gmra.mxu2 %vm105_vm0, %v83_v27  ;;  %v1365_v25 = vld [vmem:[#allocation2 + $0x40] sm:$0xff] }
  0x59   :  { %826 = vmatmul.msk.f32.gmra.mxu3 %vm105_vm0, %v88_v28  ;;  %814 = vmatmul.msk.f32.gmra.mxu0 %vm105_vm0, %v76_v29  ;;  %v1373_v29 = vld [vmem:[%s1712_s4 + $0x58] sm:$0xff] }
  0x5a   :  { %822 = vmatmul.msk.f32.gmra.mxu2 %vm105_vm0, %v84_v30  ;;  %818 = vmatmul.msk.f32.gmra.mxu1 %vm105_vm0, %v80_v31  ;;  %1741 = vst [vmem:[#allocation14_spill] sm:$0xff] %v1373_v29  ;;  %v1383_v31 = vld [vmem:[%s1712_s4 + $0x18] sm:$0xff] }
  0x5b   :  { %52 = vst.msk [vmem:[#allocation2 + $0x58] sm:$0xff] %vm40_vm1, %v1373_v29 }
  0x5c   :  { %1742 = vst [vmem:[#allocation15_spill] sm:$0xff] %v1383_v31 }
  0x5d   :  { %44 = vst.msk [vmem:[#allocation2 + $0x18] sm:$0xff] %vm40_vm1, %v1383_v31 }
  0xbe   :  { %v219_v33 = vpop.f32.mrf.mxu0 }
  0xbf   :  { %v1189_v34 = vmul.f32 %v880_v32, %v219_v33  ;;  %v231_v35 = vpop.f32.mrf.mxu1 }
  0xc0   :  { %v1191_v36 = vmul.f32 %v880_v32, %v231_v35  ;;  %v1395_v35 = vld [vmem:[#allocation2 + $0x68] sm:$0xff] }
  0xc1   :  { %303 = vmax.xlane.f32.xlu0 %v1189_v34 }
  0xc2   :  { %311 = vmax.xlane.f32.xlu2 %v1191_v36 }
  0xc4   :  { %v255_v37 = vpop.f32.mrf.mxu3 }
  0xc5   :  { %v1195_v38 = vmul.f32 %v880_v32, %v255_v37  ;;  %v243_v39 = vpop.f32.mrf.mxu2  ;;  %v1399_v37 = vld [vmem:[#allocation2 + $0x8] sm:$0xff] }
  0xc6   :  { %v1197_v40 = vmul.f32 %v880_v32, %v243_v39  ;;  %v222_v41 = vpop.f32.mrf.mxu0 }
  0xc7   :  { %v234_v42 = vpop.f32.mrf.mxu1  ;;  %v1201_v44 = vmul.f32 %v880_v32, %v222_v41 }
  0xc8   :  { %v1205_v47 = vmul.f32 %v880_v32, %v234_v42  ;;  %v1404_v42 = vld [vmem:[#allocation2 + $0x28] sm:$0xff] }
  0xc9   :  { %327 = vmax.xlane.f32.xlu0 %v1195_v38 }
  0xca   :  { %319 = vmax.xlane.f32.xlu2 %v1197_v40 }
  0xcc   :  { %v258_v43 = vpop.f32.mrf.mxu3 }
  0xcd   :  { %v246_v45 = vpop.f32.mrf.mxu2  ;;  %v1203_v46 = vmul.f32 %v880_v32, %v258_v43 }
  0xce   :  { %v225_v49 = vpop.f32.mrf.mxu0  ;;  %v1219_v51 = vmul.f32 %v880_v32, %v246_v45 }
  0xcf   :  { %329 = vmax.xlane.f32.xlu1 %v1203_v46  ;;  %v1217_v50 = vmul.f32 %v880_v32, %v225_v49  ;;  %v237_v55 = vpop.f32.mrf.mxu1 }
  0xd0   :  { %v1228_v57 = vmul.f32 %v880_v32, %v237_v55 }
  0xd1   :  { %305 = vmax.xlane.f32.xlu0 %v1201_v44 }
  0xd2   :  { %313 = vmax.xlane.f32.xlu2 %v1205_v47 }
  0xd4   :  { %v261_v52 = vpop.f32.mrf.mxu3 }
  0xd5   :  { %v249_v53 = vpop.f32.mrf.mxu2  ;;  %v1221_v54 = vmul.f32 %v880_v32, %v261_v52 }
  0xd6   :  { %v1226_v56 = vmul.f32 %v880_v32, %v249_v53  ;;  %v228_v60 = vpop.f32.mrf.mxu0  ;;  %v1416_v53 = vld [vmem:[%s1712_s4 + $0x38] sm:$0xff] }
  0xd7   :  { %307 = vmax.xlane.f32.xlu1 %v1217_v50  ;;  %v1235_v62 = vmul.f32 %v880_v32, %v228_v60  ;;  %v240_v0 = vpop.f32.mrf.mxu1  ;;  %1743 = vst [vmem:[#allocation16_spill] sm:$0xff] %v1416_v53  ;;  %v1469_v60 = vld [vmem:[#allocation2 + $0x58] sm:$0xff] }
  0xd8   :  { %v1241_v1 = vmul.f32 %v880_v32, %v240_v0  ;;  %48 = vst.msk [vmem:[#allocation2 + $0x38] sm:$0xff] %vm40_vm1, %v1416_v53  ;;  %v1435_v0 = vld [vmem:[#allocation2 + $0x48] sm:$0xff] }
  0xd9   :  { %321 = vmax.xlane.f32.xlu0 %v1219_v51 }
  0xda   :  { %331 = vmax.xlane.f32.xlu2 %v1221_v54 }
  0xdc   :  { %v264_v61 = vpop.f32.mrf.mxu3 }
  0xdd   :  { %v252_v58 = vpop.f32.mrf.mxu2  ;;  %v1237_v63 = vmul.f32 %v880_v32, %v264_v61  ;;  %v1433_v61 = vld [vmem:[#allocation2 + $0x10] sm:$0xff] }
  0xde   :  { %v1230_v59 = vmul.f32 %v880_v32, %v252_v58 }
  0xdf   :  { %323 = vmax.xlane.f32.xlu1 %v1226_v56 }
  0xe1   :  { %315 = vmax.xlane.f32.xlu0 %v1228_v57 }
  0xe2   :  { %325 = vmax.xlane.f32.xlu2 %v1230_v59 }
  0xe7   :  { %309 = vmax.xlane.f32.xlu1 %v1235_v62 }
  0xe9   :  { %333 = vmax.xlane.f32.xlu0 %v1237_v63 }
  0xef   :  { %317 = vmax.xlane.f32.xlu1 %v1241_v1 }
 0x134   :  { %v304_v15 = vpop.xlane.xlu0 %303 }
 0x135   :  { %v1328_v16 = vmax.f32 %v1322_v13, %v304_v15  ;;  %v312_v17 = vpop.xlane.xlu2 %311  ;;  %v1440_v15 = vld [vmem:[#allocation2 + $0x70] sm:$0xff] }
 0x136   :  { %v1336_v19 = vmax.f32 %v1325_v14, %v312_v17  ;;  %1744 = vst [vmem:[#allocation17_spill] sm:$0xff] %v1440_v15 }
 0x137   :  { %644 = vst.msk [vmem:[#allocation2] sm:$0xff] %vm40_vm1, %v1328_v16  ;;  %353 = vperm.xlu1 %877, %v1328_v16  }
 0x138   :  { %648 = vst.msk [vmem:[#allocation2 + $0x20] sm:$0xff] %vm40_vm1, %v1336_v19 }
 0x13c   :  { %v328_v26 = vpop.xlane.xlu0 %327 }
 0x13d   :  { %v1368_v27 = vmax.f32 %v1361_v24, %v328_v26  ;;  %v320_v28 = vpop.xlane.xlu2 %319 }
 0x13e   :  { %v1376_v30 = vmax.f32 %v1365_v25, %v320_v28 }
 0x13f   :  { %656 = vst.msk [vmem:[#allocation2 + $0x60] sm:$0xff] %vm40_vm1, %v1368_v27  ;;  %413 = vperm.xlu0 %878, %v1368_v27   ;;  %373 = vperm.xlu1 %877, %v1336_v19  }
 0x140   :  { %652 = vst.msk [vmem:[#allocation2 + $0x40] sm:$0xff] %vm40_vm1, %v1376_v30 }
 0x142   :  { %v330_v39 = vpop.xlane.xlu1 %329 }
 0x143   :  { %v1402_v41 = vmax.f32 %v1395_v35, %v330_v39 }
 0x144   :  { %v306_v43 = vpop.xlane.xlu0 %305 }
 0x145   :  { %v1407_v45 = vmax.f32 %v1399_v37, %v306_v43  ;;  %657 = vst.msk [vmem:[#allocation2 + $0x68] sm:$0xff] %vm40_vm1, %v1402_v41  ;;  %v314_v52 = vpop.xlane.xlu2 %313 }
 0x146   :  { %v1419_v55 = vmax.f32 %v1404_v42, %v314_v52 }
 0x147   :  { %645 = vst.msk [vmem:[#allocation2 + $0x8] sm:$0xff] %vm40_vm1, %v1407_v45  ;;  %358 = vperm.xlu2 %879, %v1407_v45   ;;  %393 = vperm.xlu1 %877, %v1376_v30  }
 0x148   :  { %649 = vst.msk [vmem:[#allocation2 + $0x28] sm:$0xff] %vm40_vm1, %v1419_v55 }
 0x14a   :  { %v308_v4 = vpop.xlane.xlu1 %307 }
 0x14b   :  { %v1438_v7 = vmax.f32 %v1433_v61, %v308_v4  ;;  %v1494_v4 = vld [vmem:[#allocation2 + $0x78] sm:$0xff] }
 0x14c   :  { %v322_v17 = vpop.xlane.xlu0 %321 }
 0x14d   :  { %v1443_v26 = vmax.f32 %v1435_v0, %v322_v17  ;;  %646 = vst.msk [vmem:[#allocation2 + $0x10] sm:$0xff] %vm40_vm1, %v1438_v7  ;;  %v332_v39 = vpop.xlane.xlu2 %331  ;;  %v1462_v17 = vld [vmem:[#allocation2 + $0x50] sm:$0xff] }
 0x14e   :  { %v1450_v43 = vmax.f32 %v1440_v15, %v332_v39  ;;  %v1464_v39 = vld [vmem:[#allocation2 + $0x30] sm:$0xff] }
 0x14f   :  { %653 = vst.msk [vmem:[#allocation2 + $0x48] sm:$0xff] %vm40_vm1, %v1443_v26  ;;  %378 = vperm.xlu2 %879, %v1419_v55   ;;  %398 = vperm.xlu0 %878, %v1443_v26  }
 0x150   :  { %1745 = vst [vmem:[#allocation18_spill] sm:$0xff] %v1450_v43 }
 0x151   :  { %658 = vst.msk [vmem:[#allocation2 + $0x70] sm:$0xff] %vm40_vm1, %v1450_v43 }
 0x152   :  { %v324_v49 = vpop.xlane.xlu1 %323 }
 0x153   :  { %v1467_v28 = vmax.f32 %v1462_v17, %v324_v49 }
 0x154   :  { %v316_v52 = vpop.xlane.xlu0 %315 }
 0x155   :  { %v1472_v58 = vmax.f32 %v1464_v39, %v316_v52  ;;  %654 = vst.msk [vmem:[#allocation2 + $0x50] sm:$0xff] %vm40_vm1, %v1467_v28  ;;  %v326_v33 = vpop.xlane.xlu2 %325 }
 0x156   :  { %v1479_v23 = vmax.f32 %v1469_v60, %v326_v33  ;;  %v1492_v33 = vld [vmem:[#allocation2 + $0x18] sm:$0xff] }
 0x157   :  { %650 = vst.msk [vmem:[#allocation2 + $0x30] sm:$0xff] %vm40_vm1, %v1472_v58  ;;  %418 = vperm.xlu2 %879, %v1402_v41   ;;  %363 = vperm.xlu0 %878, %v1438_v7  }
 0x158   :  { %1746 = vst [vmem:[#allocation19_spill] sm:$0xff] %v1479_v23  ;;  %383 = vperm.xlu1 %877, %v1472_v58  }
 0x159   :  { %655 = vst.msk [vmem:[#allocation2 + $0x58] sm:$0xff] %vm40_vm1, %v1479_v23 }
 0x15a   :  { %v310_v49 = vpop.xlane.xlu1 %309 }
 0x15b   :  { %v1497_v32 = vmax.f32 %v1492_v33, %v310_v49 }
 0x15c   :  { %v334_v21 = vpop.xlane.xlu0 %333 }
 0x15d   :  { %v1500_v18 = vmax.f32 %v1494_v4, %v334_v21  ;;  %647 = vst.msk [vmem:[#allocation2 + $0x18] sm:$0xff] %vm40_vm1, %v1497_v32  ;;  %v1513_v21 = vld [vmem:[#allocation2 + $0x38] sm:$0xff] }
 0x15f   :  { %659 = vst.msk [vmem:[#allocation2 + $0x78] sm:$0xff] %vm40_vm1, %v1500_v18  ;;  %428 = vperm.xlu0 %878, %v1500_v18   ;;  %403 = vperm.xlu2 %879, %v1467_v28  }
 0x160   :  { %423 = vperm.xlu1 %877, %v1450_v43   ;;  %v1533_v43 = vld [vmem:[%s1713_s3] ss:$0 sm:$0xff] }
 0x162   :  { %v318_v49 = vpop.xlane.xlu1 %317 }
 0x163   :  { %v1516_v29 = vmax.f32 %v1513_v21, %v318_v49 }
 0x165   :  { %651 = vst.msk [vmem:[#allocation2 + $0x38] sm:$0xff] %vm40_vm1, %v1516_v29 }
 0x167   :  { %368 = vperm.xlu2 %879, %v1497_v32  }
 0x168   :  { %408 = vperm.xlu1 %877, %v1479_v23  }
 0x16f   :  { %388 = vperm.xlu2 %879, %v1516_v29  }
 0x1a1   :  { %v359_v52 = vpop.permute.xlu2 %358 }
 0x1a9   :  { %v379_v10 = vpop.permute.xlu2 %378  ;;  %v354_v11 = vpop.permute.xlu1 %353 }
 0x1aa   :  { %v431_v53 = vsub.f32 %v1189_v34, %v354_v11  ;;  %v432_v34 = vsub.f32 %v1201_v44, %v359_v52 }
 0x1ac   :  { %v447_v31 = vmul.f32 1.442695, %v431_v53 }
 0x1ae   :  { %882 = vpow2.f32 %v447_v31 }
 0x1b1   :  { %v1526_v49 = vpop.permute.xlu2 %418  ;;  %v414_v12 = vpop.permute.xlu0 %413 }
 0x1b2   :  { %v443_v20 = vsub.f32 %v1195_v38, %v414_v12  ;;  %v374_v22 = vpop.permute.xlu1 %373  ;;  %v449_v38 = vmul.f32 1.442695, %v432_v34 }
 0x1b3   :  { %v435_v8 = vsub.f32 %v1191_v36, %v374_v22 }
 0x1b4   :  { %v471_v9 = vmul.f32 1.442695, %v443_v20  ;;  %v883_v15 = vpop.eup %882  ;;  %v436_v20 = vsub.f32 %v1205_v47, %v379_v10 }
 0x1b5   :  { %v455_v6 = vmul.f32 1.442695, %v435_v8  ;;  %v483_v11 = vmul.f32 %v883_v15, %v1533_v43 }
 0x1b6   :  { %884 = vpow2.f32 %v471_v9 }
 0x1b7   :  { %886 = vpow2.f32 %v455_v6  ;;  %579 = vadd.xlane.f32.xlu2 %v483_v11  ;;  %v457_v6 = vmul.f32 1.442695, %v436_v20 }
 0x1b8   :  { %888 = vpow2.f32 %v449_v38 }
 0x1b9   :  { %v404_v31 = vpop.permute.xlu2 %403 }
 0x1ba   :  { %v394_v12 = vpop.permute.xlu1 %393  ;;  %v441_v53 = vsub.f32 %v1226_v56, %v404_v31 }
 0x1bb   :  { %v439_v36 = vsub.f32 %v1197_v40, %v394_v12 }
 0x1bc   :  { %v885_v22 = vpop.eup %884  ;;  %v467_v9 = vmul.f32 1.442695, %v441_v53 }
 0x1bd   :  { %v463_v5 = vmul.f32 1.442695, %v439_v36  ;;  %v887_v23 = vpop.eup %886  ;;  %v495_v44 = vmul.f32 %v885_v22, %v1533_v43 }
 0x1be   :  { %v487_v8 = vmul.f32 %v887_v23, %v1533_v43  ;;  %v889_v47 = vpop.eup %888 }
 0x1bf   :  { %890 = vpow2.f32 %v463_v5  ;;  %603 = vadd.xlane.f32.xlu0 %v495_v44  ;;  %v484_v23 = vmul.f32 %v889_v47, %v1533_v43 }
 0x1c0   :  { %587 = vadd.xlane.f32.xlu1 %v487_v8  ;;  %892 = vpow2.f32 %v457_v6 }
 0x1c1   :  { %v399_v15 = vpop.permute.xlu0 %398  ;;  %v369_v52 = vpop.permute.xlu2 %368  ;;  %894 = vpow2.f32 %v467_v9  ;;  %v444_v9 = vsub.f32 %v1203_v46, %v1526_v49 }
 0x1c2   :  { %v440_v40 = vsub.f32 %v1219_v51, %v399_v15  ;;  %v434_v34 = vsub.f32 %v1235_v62, %v369_v52 }
 0x1c4   :  { %v465_v10 = vmul.f32 1.442695, %v440_v40  ;;  %v453_v11 = vmul.f32 1.442695, %v434_v34  ;;  %v473_v40 = vmul.f32 1.442695, %v444_v9 }
 0x1c5   :  { %v891_v56 = vpop.eup %890 }
 0x1c6   :  { %896 = vpow2.f32 %v465_v10  ;;  %v491_v5 = vmul.f32 %v891_v56, %v1533_v43  ;;  %v893_v12 = vpop.eup %892 }
 0x1c7   :  { %v895_v22 = vpop.eup %894  ;;  %898 = vpow2.f32 %v453_v11  ;;  %v488_v15 = vmul.f32 %v893_v12, %v1533_v43 }
 0x1c8   :  { %595 = vadd.xlane.f32.xlu2 %v491_v5  ;;  %581 = vadd.xlane.f32.xlu1 %v484_v23 }
 0x1c9   :  { %v364_v31 = vpop.permute.xlu0 %363  ;;  %v389_v38 = vpop.permute.xlu2 %388 }
 0x1ca   :  { %v433_v51 = vsub.f32 %v1217_v50, %v364_v31  ;;  %v438_v36 = vsub.f32 %v1241_v1, %v389_v38  ;;  %v384_v20 = vpop.permute.xlu1 %383  ;;  %v493_v50 = vmul.f32 %v895_v22, %v1533_v43 }
 0x1cb   :  { %v437_v8 = vsub.f32 %v1228_v57, %v384_v20 }
 0x1cc   :  { %v897_v53 = vpop.eup %896  ;;  %v451_v44 = vmul.f32 1.442695, %v433_v51  ;;  %v461_v62 = vmul.f32 1.442695, %v438_v36 }
 0x1cd   :  { %v492_v6 = vmul.f32 %v897_v53, %v1533_v43  ;;  %v459_v1 = vmul.f32 1.442695, %v437_v8  ;;  %v899_v57 = vpop.eup %898 }
 0x1ce   :  { %900 = vpow2.f32 %v451_v44  ;;  %v486_v5 = vmul.f32 %v899_v57, %v1533_v43 }
 0x1cf   :  { %902 = vpow2.f32 %v461_v62  ;;  %597 = vadd.xlane.f32.xlu0 %v492_v6  ;;  %v1747_v6 = vsub.f32 %v1322_v13, %v1328_v16  ;;  %v1750_v13 = vsub.f32 %v1365_v25, %v1376_v30 }
 0x1d0   :  { %589 = vadd.xlane.f32.xlu2 %v488_v15  ;;  %599 = vadd.xlane.f32.xlu1 %v493_v50  ;;  %904 = vpow2.f32 %v459_v1  ;;  %v1748_v15 = vsub.f32 %v1361_v24, %v1368_v27  ;;  %v1749_v1 = vsub.f32 %v1325_v14, %v1336_v19  ;;  %v559_v14 = vld [vmem:[#allocation3 + $0x60] sm:$0xff] }
 0x1d1   :  { %v429_v52 = vpop.permute.xlu0 %428  ;;  %906 = vpow2.f32 %v473_v40  ;;  %v515_v9 = vmul.f32 1.442695, %v1747_v6  ;;  %v531_v16 = vmul.f32 1.442695, %v1750_v13 }
 0x1d2   :  { %v424_v47 = vpop.permute.xlu1 %423  ;;  %v446_v56 = vsub.f32 %v1237_v63, %v429_v52  ;;  %v539_v50 = vmul.f32 1.442695, %v1748_v15  ;;  %v523_v52 = vmul.f32 1.442695, %v1749_v1  ;;  %v663_v15 = vld [vmem:[#allocation2] sm:$0xff] }
 0x1d3   :  { %v445_v63 = vsub.f32 %v1221_v54, %v424_v47  ;;  %v547_v47 = vld [vmem:[#allocation3] sm:$0xff] }
 0x1d4   :  { %v901_v10 = vpop.eup %900  ;;  %v477_v23 = vmul.f32 1.442695, %v446_v56  ;;  %v1751_v56 = vsub.f32 %v1399_v37, %v1407_v45  ;;  %v1753_v37 = vsub.f32 %v1404_v42, %v1419_v55 }
 0x1d5   :  { %v903_v34 = vpop.eup %902  ;;  %v485_v46 = vmul.f32 %v901_v10, %v1533_v43  ;;  %v475_v22 = vmul.f32 1.442695, %v445_v63 }
 0x1d6   :  { %v490_v49 = vmul.f32 %v903_v34, %v1533_v43  ;;  %v905_v11 = vpop.eup %904  ;;  %908 = vpow2.f32 %v477_v23  ;;  %v517_v24 = vmul.f32 1.442695, %v1751_v56  ;;  %v551_v34 = vld [vmem:[#allocation3 + $0x20] sm:$0xff]  ;;  %v1752_v23 = vsub.f32 %v1435_v0, %v1443_v26 }
 0x1d7   :  { %583 = vadd.xlane.f32.xlu0 %v485_v46  ;;  %v907_v12 = vpop.eup %906  ;;  %v489_v36 = vmul.f32 %v905_v11, %v1533_v43  ;;  %v525_v45 = vmul.f32 1.442695, %v1753_v37  ;;  %v555_v0 = vld [vmem:[#allocation3 + $0x40] sm:$0xff] }
 0x1d8   :  { %585 = vadd.xlane.f32.xlu2 %v486_v5  ;;  %593 = vadd.xlane.f32.xlu1 %v490_v49  ;;  %v496_v20 = vmul.f32 %v907_v12, %v1533_v43  ;;  %v533_v25 = vmul.f32 1.442695, %v1752_v23  ;;  %v1754_v12 = vsub.f32 %v1462_v17, %v1467_v28  ;;  %v1755_v28 = vsub.f32 %v1433_v61, %v1438_v7  ;;  %v556_v61 = vld [vmem:[#allocation3 + $0x48] sm:$0xff] }
 0x1da   :  { %v409_v31 = vpop.permute.xlu1 %408  ;;  %v535_v63 = vmul.f32 1.442695, %v1754_v12  ;;  %v519_v17 = vmul.f32 1.442695, %v1755_v28  ;;  %v554_v12 = vld [vmem:[#allocation3 + $0x38] sm:$0xff]  ;;  %v1760_v28 = vsub.f32 %v1494_v4, %v1500_v18 }
 0x1db   :  { %v442_v38 = vsub.f32 %v1230_v59, %v409_v31 }
 0x1dc   :  { %v909_v53 = vpop.eup %908 }
 0x1dd   :  { %v469_v51 = vmul.f32 1.442695, %v442_v38  ;;  %v498_v62 = vmul.f32 %v909_v53, %v1533_v43 }
 0x1df   :  { %910 = vpow2.f32 %v469_v51  ;;  %591 = vadd.xlane.f32.xlu0 %v489_v36  ;;  %v548_v36 = vld [vmem:[#allocation3 + $0x8] sm:$0xff] }
 0x1e0   :  { %605 = vadd.xlane.f32.xlu1 %v496_v20  ;;  %912 = vpow2.f32 %v475_v22 }
 0x1e1   :  { %914 = vpow2.f32 %v515_v9 }
 0x1e2   :  { %916 = vpow2.f32 %v539_v50  ;;  %v1757_v50 = vsub.f32 %v1513_v21, %v1516_v29 }
 0x1e3   :  { %918 = vpow2.f32 %v523_v52 }
 0x1e4   :  { %920 = vpow2.f32 %v531_v16  ;;  %v529_v1 = vmul.f32 1.442695, %v1757_v50 }
 0x1e5   :  { %v911_v44 = vpop.eup %910  ;;  %922 = vpow2.f32 %v517_v24  ;;  %v1758_v24 = vsub.f32 %v1464_v39, %v1472_v58  ;;  %v549_v58 = vld [vmem:[#allocation3 + $0x10] sm:$0xff] }
 0x1e6   :  { %v494_v59 = vmul.f32 %v911_v44, %v1533_v43  ;;  %v913_v8 = vpop.eup %912 }
 0x1e7   :  { %609 = vadd.xlane.f32.xlu0 %v498_v62  ;;  %v497_v54 = vmul.f32 %v913_v8, %v1533_v43  ;;  %v915_v40 = vpop.eup %914  ;;  %v1756_v62 = vsub.f32 %v1492_v33, %v1497_v32  ;;  %v552_v32 = vld [vmem:[#allocation3 + $0x28] sm:$0xff] }
 0x1e8   :  { %601 = vadd.xlane.f32.xlu2 %v494_v59  ;;  %v563_v57 = vmul.f32 %v915_v40, %v547_v47  ;;  %v917_v27 = vpop.eup %916  ;;  %v557_v47 = vld [vmem:[#allocation3 + $0x50] sm:$0xff] }
 0x1e9   :  { %v919_v19 = vpop.eup %918  ;;  %v575_v46 = vmul.f32 %v917_v27, %v559_v14  ;;  %v521_v59 = vmul.f32 1.442695, %v1756_v62  ;;  %v527_v27 = vmul.f32 1.442695, %v1758_v24  ;;  %v1761_v62 = vld [vmem:[#allocation19_spill] sm:$0xff]  ;;  %v1766_v24 = vld [vmem:[#allocation18_spill] sm:$0xff] }
 0x1ea   :  { %v567_v5 = vmul.f32 %v919_v19, %v551_v34  ;;  %v921_v51 = vpop.eup %920  ;;  %v1759_v34 = vsub.f32 %v1395_v35, %v1402_v41  ;;  %v550_v35 = vld [vmem:[#allocation3 + $0x18] sm:$0xff] }
 0x1eb   :  { %v923_v26 = vpop.eup %922  ;;  %v571_v42 = vmul.f32 %v921_v51, %v555_v0 }
 0x1ec   :  { %v564_v20 = vmul.f32 %v923_v26, %v548_v36 }
 0x1f0   :  { %607 = vadd.xlane.f32.xlu2 %v497_v54 }
 0x22a   :  { %v580_v43 = vpop.xlane.xlu2 %579 }
 0x22b   :  { %v611_v10 = vadd.f32 %v580_v43, %v563_v57 }
 0x22d   :  { %628 = vst.msk [vmem:[#allocation3] sm:$0xff] %vm40_vm1, %v611_v10 }
 0x232   :  { %v604_v49 = vpop.xlane.xlu0 %603 }
 0x233   :  { %v623_v30 = vadd.f32 %v604_v49, %v575_v46  ;;  %v588_v11 = vpop.xlane.xlu1 %587  ;;  %v541_v46 = vmul.f32 1.442695, %v1759_v34 }
 0x234   :  { %v679_v31 = vld [vmem:[#allocation3] sm:$0xff]  ;;  %v615_v38 = vadd.f32 %v588_v11, %v567_v5 }
 0x235   :  { %924 = vlog2.f32 %v679_v31  ;;  %640 = vst.msk [vmem:[#allocation3 + $0x60] sm:$0xff] %vm40_vm1, %v623_v30  ;;  %v675_v30 = vld [vmem:[#allocation2 + $0x60] sm:$0xff] }
 0x236   :  { %632 = vst.msk [vmem:[#allocation3 + $0x20] sm:$0xff] %vm40_vm1, %v615_v38  ;;  %926 = vpow2.f32 %v533_v25 }
 0x237   :  { %928 = vpow2.f32 %v525_v45  ;;  %v667_v45 = vld [vmem:[#allocation2 + $0x20] sm:$0xff] }
 0x238   :  { %930 = vpow2.f32 %v535_v63 }
 0x23b   :  { %v596_v55 = vpop.xlane.xlu2 %595  ;;  %v925_v22 = vpop.eup %924 }
 0x23c   :  { %v619_v53 = vadd.f32 %v596_v55, %v571_v42  ;;  %v582_v44 = vpop.xlane.xlu1 %581  ;;  %v696_v8 = vmul.f32 0.6931472, %v925_v22  ;;  %v691_v54 = vld [vmem:[#allocation3 + $0x60] sm:$0xff]  ;;  %v927_v9 = vpop.eup %926 }
 0x23d   :  { %v612_v6 = vadd.f32 %v582_v44, %v564_v20  ;;  %932 = vlog2.f32 %v691_v54  ;;  %v683_v52 = vld [vmem:[#allocation3 + $0x20] sm:$0xff]  ;;  %v929_v7 = vpop.eup %928  ;;  %v572_v43 = vmul.f32 %v927_v9, %v556_v61 }
 0x23e   :  { %636 = vst.msk [vmem:[#allocation3 + $0x40] sm:$0xff] %vm40_vm1, %v619_v53  ;;  %v727_v40 = vadd.f32 %v696_v8, %v663_v15  ;;  %934 = vlog2.f32 %v683_v52  ;;  %v931_v33 = vpop.eup %930  ;;  %v568_v21 = vmul.f32 %v929_v7, %v552_v32  ;;  %v671_v9 = vld [vmem:[#allocation2 + $0x40] sm:$0xff]  ;;  %v664_v52 = vld [vmem:[#allocation2 + $0x8] sm:$0xff] }
 0x23f   :  { %629 = vst.msk [vmem:[#allocation3 + $0x8] sm:$0xff] %vm40_vm1, %v612_v6  ;;  %936 = vpow2.f32 %v519_v17  ;;  %v573_v16 = vmul.f32 %v931_v33, %v557_v47  ;;  %v545_v17 = vmul.f32 1.442695, %v1760_v28  ;;  %v1763_v32 = vld [vmem:[#allocation4_spill] sm:$0xff] }
 0x240   :  { %938 = vpow2.f32 %v521_v59  ;;  %v759_v57 = vsub.f32 %v727_v40, %v1211_v48  ;;  %v1762_v59 = vsub.f32 %v1469_v60, %v1761_v62  ;;  %v560_v40 = vld [vmem:[#allocation3 + $0x68] sm:$0xff] }
 0x241   :  { %940 = vpow2.f32 %v529_v1  ;;  %v553_v1 = vld [vmem:[#allocation3 + $0x30] sm:$0xff] }
 0x242   :  { %v598_v29 = vpop.xlane.xlu0 %597  ;;  %775 = vst.msk [vmem:[%s1714_s5] sm:$0xff] %vm40_vm1, %v759_v57  ;;  %v537_v8 = vmul.f32 1.442695, %v1762_v59  ;;  %v1764_v57 = vld [vmem:[#allocation5_spill] sm:$0xff] }
 0x243   :  { %v620_v10 = vadd.f32 %v598_v29, %v572_v43  ;;  %v590_v13 = vpop.xlane.xlu2 %589  ;;  %v933_v56 = vpop.eup %932 }
 0x244   :  { %v616_v14 = vadd.f32 %v590_v13, %v568_v21  ;;  %v600_v19 = vpop.xlane.xlu1 %599  ;;  %v935_v48 = vpop.eup %934  ;;  %v720_v49 = vmul.f32 0.6931472, %v933_v56  ;;  %v1765_v56 = vld [vmem:[#allocation17_spill] sm:$0xff] }
 0x245   :  { %v687_v5 = vld [vmem:[#allocation3 + $0x40] sm:$0xff]  ;;  %637 = vst.msk [vmem:[#allocation3 + $0x48] sm:$0xff] %vm40_vm1, %v620_v10  ;;  %v621_v23 = vadd.f32 %v600_v19, %v573_v16  ;;  %v937_v25 = vpop.eup %936  ;;  %v704_v11 = vmul.f32 0.6931472, %v935_v48 }
 0x246   :  { %942 = vlog2.f32 %v687_v5  ;;  %v680_v37 = vld [vmem:[#allocation3 + $0x8] sm:$0xff]  ;;  %633 = vst.msk [vmem:[#allocation3 + $0x28] sm:$0xff] %vm40_vm1, %v616_v14  ;;  %v939_v39 = vpop.eup %938  ;;  %v739_v31 = vadd.f32 %v720_v49, %v675_v30  ;;  %v565_v51 = vmul.f32 %v937_v25, %v549_v58 }
 0x247   :  { %944 = vlog2.f32 %v680_v37  ;;  %638 = vst.msk [vmem:[#allocation3 + $0x50] sm:$0xff] %vm40_vm1, %v621_v23  ;;  %v941_v41 = vpop.eup %940  ;;  %v731_v38 = vadd.f32 %v704_v11, %v667_v45  ;;  %v566_v36 = vmul.f32 %v939_v39, %v550_v35  ;;  %v672_v49 = vld [vmem:[#allocation2 + $0x48] sm:$0xff]  ;;  %v562_v45 = vld [vmem:[#allocation3 + $0x78] sm:$0xff]  ;;  %v673_v35 = vld [vmem:[#allocation2 + $0x50] sm:$0xff] }
 0x248   :  { %946 = vpow2.f32 %v527_v27  ;;  %v771_v63 = vsub.f32 %v739_v31, %v1252_v3  ;;  %v570_v20 = vmul.f32 %v941_v41, %v554_v12  ;;  %v1767_v27 = vsub.f32 %v1765_v56, %v1766_v24  ;;  %v668_v11 = vld [vmem:[#allocation2 + $0x28] sm:$0xff]  ;;  %v1768_v12 = vld [vmem:[#allocation7_spill] sm:$0xff]  ;;  %v669_v56 = vld [vmem:[#allocation2 + $0x30] sm:$0xff] }
 0x249   :  { %948 = vpow2.f32 %v541_v46  ;;  %v763_v0 = vsub.f32 %v731_v38, %v1247_v2  ;;  %v558_v38 = vld [vmem:[#allocation3 + $0x58] sm:$0xff] }
 0x24a   :  { %v584_v26 = vpop.xlane.xlu0 %583  ;;  %787 = vst.msk [vmem:[%s1714_s5 + $0x60] sm:$0xff] %vm40_vm1, %v771_v63  ;;  %v543_v14 = vmul.f32 1.442695, %v1767_v27 }
 0x24b   :  { %v613_v42 = vadd.f32 %v584_v26, %v565_v51  ;;  %v586_v55 = vpop.xlane.xlu2 %585  ;;  %779 = vst.msk [vmem:[%s1714_s5 + $0x20] sm:$0xff] %vm40_vm1, %v763_v0  ;;  %v1769_v0 = vld [vmem:[#allocation6_spill] sm:$0xff] }
 0x24c   :  { %v943_v22 = vpop.eup %942  ;;  %v688_v2 = vld [vmem:[#allocation3 + $0x48] sm:$0xff]  ;;  %v614_v3 = vadd.f32 %v586_v55, %v566_v36  ;;  %v594_v53 = vpop.xlane.xlu1 %593 }
 0x24d   :  { %v945_v44 = vpop.eup %944  ;;  %v712_v54 = vmul.f32 0.6931472, %v943_v22  ;;  %950 = vlog2.f32 %v688_v2  ;;  %v684_v6 = vld [vmem:[#allocation3 + $0x28] sm:$0xff]  ;;  %630 = vst.msk [vmem:[#allocation3 + $0x10] sm:$0xff] %vm40_vm1, %v613_v42  ;;  %v618_v18 = vadd.f32 %v594_v53, %v570_v20 }
 0x24e   :  { %v947_v4 = vpop.eup %946  ;;  %v698_v15 = vmul.f32 0.6931472, %v945_v44  ;;  %952 = vlog2.f32 %v684_v6  ;;  %v689_v50 = vld [vmem:[#allocation3 + $0x50] sm:$0xff]  ;;  %631 = vst.msk [vmem:[#allocation3 + $0x18] sm:$0xff] %vm40_vm1, %v614_v3  ;;  %v1770_v42 = vld [vmem:[#allocation13_spill] sm:$0xff]  ;;  %v666_v6 = vld [vmem:[#allocation2 + $0x18] sm:$0xff] }
 0x24f   :  { %v735_v61 = vadd.f32 %v712_v54, %v671_v9  ;;  %954 = vlog2.f32 %v689_v50  ;;  %635 = vst.msk [vmem:[#allocation3 + $0x38] sm:$0xff] %vm40_vm1, %v618_v18  ;;  %v949_v60 = vpop.eup %948  ;;  %v569_v47 = vmul.f32 %v947_v4, %v553_v1  ;;  %v670_v50 = vld [vmem:[#allocation2 + $0x38] sm:$0xff] }
 0x250   :  { %956 = vpow2.f32 %v545_v17  ;;  %v728_v7 = vadd.f32 %v698_v15, %v664_v52  ;;  %v576_v13 = vmul.f32 %v949_v60, %v560_v40  ;;  %v561_v52 = vld [vmem:[#allocation3 + $0x70] sm:$0xff]  ;;  %v1772_v40 = vld [vmem:[#allocation15_spill] sm:$0xff] }
 0x251   :  { %958 = vpow2.f32 %v537_v8  ;;  %v767_v33 = vsub.f32 %v735_v61, %v1763_v32  ;;  %v665_v8 = vld [vmem:[#allocation2 + $0x10] sm:$0xff] }
 0x252   :  { %v760_v43 = vsub.f32 %v728_v7, %v1764_v57  ;;  %v592_v29 = vpop.xlane.xlu0 %591  ;;  %v1771_v61 = vld [vmem:[#allocation10_spill] sm:$0xff] }
 0x253   :  { %v951_v21 = vpop.eup %950  ;;  %783 = vst.msk [vmem:[%s1714_s5 + $0x40] sm:$0xff] %vm40_vm1, %v767_v33  ;;  %v617_v10 = vadd.f32 %v592_v29, %v569_v47  ;;  %v1773_v33 = vld [vmem:[#allocation16_spill] sm:$0xff] }
 0x254   :  { %v953_v16 = vpop.eup %952  ;;  %776 = vst.msk [vmem:[%s1714_s5 + $0x8] sm:$0xff] %vm40_vm1, %v760_v43  ;;  %v714_v19 = vmul.f32 0.6931472, %v951_v21  ;;  %v681_v48 = vld [vmem:[#allocation3 + $0x10] sm:$0xff]  ;;  %v606_v34 = vpop.xlane.xlu1 %605 }
 0x255   :  { %v955_v46 = vpop.eup %954  ;;  %v706_v5 = vmul.f32 0.6931472, %v953_v16  ;;  %960 = vlog2.f32 %v681_v48  ;;  %v682_v23 = vld [vmem:[#allocation3 + $0x18] sm:$0xff]  ;;  %634 = vst.msk [vmem:[#allocation3 + $0x30] sm:$0xff] %vm40_vm1, %v617_v10  ;;  %v624_v25 = vadd.f32 %v606_v34, %v576_v13  ;;  %v1774_v48 = vld [vmem:[#allocation9_spill] sm:$0xff] }
 0x256   :  { %v957_v30 = vpop.eup %956  ;;  %v736_v37 = vadd.f32 %v714_v19, %v672_v49  ;;  %v716_v58 = vmul.f32 0.6931472, %v955_v46  ;;  %962 = vlog2.f32 %v682_v23  ;;  %v686_v39 = vld [vmem:[#allocation3 + $0x38] sm:$0xff]  ;;  %v676_v19 = vld [vmem:[#allocation2 + $0x68] sm:$0xff]  ;;  %v1775_v49 = vld [vmem:[#allocation8_spill] sm:$0xff] }
 0x257   :  { %v959_v31 = vpop.eup %958  ;;  %v732_v41 = vadd.f32 %v706_v5, %v668_v11  ;;  %964 = vlog2.f32 %v686_v39  ;;  %641 = vst.msk [vmem:[#allocation3 + $0x68] sm:$0xff] %vm40_vm1, %v624_v25  ;;  %v578_v36 = vmul.f32 %v957_v30, %v562_v45  ;;  %v678_v11 = vld [vmem:[#allocation2 + $0x78] sm:$0xff] }
 0x258   :  { %v768_v63 = vsub.f32 %v736_v37, %v1768_v12  ;;  %v737_v51 = vadd.f32 %v716_v58, %v673_v35  ;;  %966 = vpow2.f32 %v543_v14  ;;  %v574_v22 = vmul.f32 %v959_v31, %v558_v38  ;;  %v674_v39 = vld [vmem:[#allocation2 + $0x58] sm:$0xff]  ;;  %v1776_v35 = vld [vmem:[#allocation12_spill] sm:$0xff]  ;;  %v1777_v38 = vld [vmem:[#allocation14_spill] sm:$0xff] }
 0x259   :  { %v764_v26 = vsub.f32 %v732_v41, %v1769_v0  ;;  %v677_v0 = vld [vmem:[#allocation2 + $0x70] sm:$0xff] }
 0x25a   :  { %784 = vst.msk [vmem:[%s1714_s5 + $0x48] sm:$0xff] %vm40_vm1, %v768_v63  ;;  %v769_v55 = vsub.f32 %v737_v51, %v1770_v42  ;;  %v610_v20 = vpop.xlane.xlu0 %609 }
 0x25b   :  { %v961_v28 = vpop.eup %960  ;;  %780 = vst.msk [vmem:[%s1714_s5 + $0x28] sm:$0xff] %vm40_vm1, %v764_v26  ;;  %v626_v17 = vadd.f32 %v610_v20, %v578_v36  ;;  %v602_v2 = vpop.xlane.xlu2 %601  ;;  %v1778_v36 = vld [vmem:[#allocation11_spill] sm:$0xff] }
 0x25c   :  { %v963_v3 = vpop.eup %962  ;;  %785 = vst.msk [vmem:[%s1714_s5 + $0x50] sm:$0xff] %vm40_vm1, %v769_v55  ;;  %v700_v53 = vmul.f32 0.6931472, %v961_v28  ;;  %v685_v44 = vld [vmem:[#allocation3 + $0x30] sm:$0xff]  ;;  %v622_v62 = vadd.f32 %v602_v2, %v574_v22 }
 0x25d   :  { %v965_v59 = vpop.eup %964  ;;  %v702_v54 = vmul.f32 0.6931472, %v963_v3  ;;  %968 = vlog2.f32 %v685_v44  ;;  %643 = vst.msk [vmem:[#allocation3 + $0x78] sm:$0xff] %vm40_vm1, %v626_v17 }
 0x25e   :  { %v729_v18 = vadd.f32 %v700_v53, %v665_v8  ;;  %v710_v4 = vmul.f32 0.6931472, %v965_v59  ;;  %v692_v9 = vld [vmem:[#allocation3 + $0x68] sm:$0xff]  ;;  %639 = vst.msk [vmem:[#allocation3 + $0x58] sm:$0xff] %vm40_vm1, %v622_v62  ;;  %v967_v15 = vpop.eup %966 }
 0x25f   :  { %v730_v1 = vadd.f32 %v702_v54, %v666_v6  ;;  %970 = vlog2.f32 %v692_v9  ;;  %v577_v57 = vmul.f32 %v967_v15, %v561_v52 }
 0x260   :  { %v761_v60 = vsub.f32 %v729_v18, %v1771_v61  ;;  %v734_v7 = vadd.f32 %v710_v4, %v670_v50 }
 0x261   :  { %v762_v32 = vsub.f32 %v730_v1, %v1772_v40 }
 0x262   :  { %777 = vst.msk [vmem:[%s1714_s5 + $0x10] sm:$0xff] %vm40_vm1, %v761_v60  ;;  %v766_v47 = vsub.f32 %v734_v7, %v1773_v33 }
 0x263   :  { %v969_v43 = vpop.eup %968  ;;  %778 = vst.msk [vmem:[%s1714_s5 + $0x18] sm:$0xff] %vm40_vm1, %v762_v32  ;;  %v608_v29 = vpop.xlane.xlu2 %607 }
 0x264   :  { %782 = vst.msk [vmem:[%s1714_s5 + $0x38] sm:$0xff] %vm40_vm1, %v766_v47  ;;  %v708_v21 = vmul.f32 0.6931472, %v969_v43  ;;  %v694_v10 = vld [vmem:[#allocation3 + $0x78] sm:$0xff]  ;;  %v625_v13 = vadd.f32 %v608_v29, %v577_v57 }
 0x265   :  { %v971_v16 = vpop.eup %970  ;;  %972 = vlog2.f32 %v694_v10  ;;  %v690_v24 = vld [vmem:[#allocation3 + $0x58] sm:$0xff] }
 0x266   :  { %v733_v27 = vadd.f32 %v708_v21, %v669_v56  ;;  %v722_v14 = vmul.f32 0.6931472, %v971_v16  ;;  %974 = vlog2.f32 %v690_v24  ;;  %642 = vst.msk [vmem:[#allocation3 + $0x70] sm:$0xff] %vm40_vm1, %v625_v13 }
 0x268   :  { %v765_v34 = vsub.f32 %v733_v27, %v1774_v48  ;;  %v740_v46 = vadd.f32 %v722_v14, %v676_v19 }
 0x26a   :  { %781 = vst.msk [vmem:[%s1714_s5 + $0x30] sm:$0xff] %vm40_vm1, %v765_v34  ;;  %v772_v5 = vsub.f32 %v740_v46, %v1775_v49 }
 0x26b   :  { %v973_v23 = vpop.eup %972 }
 0x26c   :  { %v975_v25 = vpop.eup %974  ;;  %788 = vst.msk [vmem:[%s1714_s5 + $0x68] sm:$0xff] %vm40_vm1, %v772_v5  ;;  %v726_v30 = vmul.f32 0.6931472, %v973_v23 }
 0x26d   :  { %v718_v37 = vmul.f32 0.6931472, %v975_v25  ;;  %v693_v58 = vld [vmem:[#allocation3 + $0x70] sm:$0xff] }
 0x26e   :  { %v742_v45 = vadd.f32 %v726_v30, %v678_v11  ;;  %976 = vlog2.f32 %v693_v58 }
 0x26f   :  { %v738_v31 = vadd.f32 %v718_v37, %v674_v39 }
 0x270   :  { %v774_v41 = vsub.f32 %v742_v45, %v1776_v35 }
 0x271   :  { %v770_v12 = vsub.f32 %v738_v31, %v1777_v38 }
 0x272   :  { %790 = vst.msk [vmem:[%s1714_s5 + $0x78] sm:$0xff] %vm40_vm1, %v774_v41 }
 0x273   :  { %786 = vst.msk [vmem:[%s1714_s5 + $0x58] sm:$0xff] %vm40_vm1, %v770_v12 }
 0x274   :  { %v977_v63 = vpop.eup %976 }
 0x275   :  { %v724_v51 = vmul.f32 0.6931472, %v977_v63 }
 0x277   :  { %v741_v26 = vadd.f32 %v724_v51, %v677_v0 }
 0x279   :  { %v773_v42 = vsub.f32 %v741_v26, %v1778_v36 }
 0x27b   :  { %789 = vst.msk [vmem:[%s1714_s5 + $0x70] sm:$0xff] %vm40_vm1, %v773_v42 }

</bundles_post_ra>
